<compile_context>
chip_gen: v6e
topology: v6e:2x2x1
jax: 0.10.0
libtpu: 0.0.40
codegen_flags: <defaults>
</compile_context>

<pallas_src>
import functools

import jax
import jax.numpy as jnp
from jax.experimental import pallas as pl
from jax.experimental.pallas import tpu as pltpu


LANE = 128              # lane width (last dim of the slab)
MAX_BLOCK_ROWS = 8192   # 8192 x 128 f32 = 4 MiB per block (2 MiB for bf16)


def _gmof_kernel(rho2, x_ref, o_ref):
    # x_ref / o_ref: (block_rows, LANE) tiles in VMEM, original dtype.
    x = x_ref[...].astype(jnp.float32)
    sq = x * x
    # Exact divide (reciprocal approx would risk the 1e-6 tolerance); the VPU
    # is nowhere near the bottleneck for this mem-bound kernel.
    o_ref[...] = (sq / (sq + rho2)).astype(o_ref.dtype)


def gmof_unscaled(residual, rho=1.0):
    """Pallas implementation of GMoF_unscaled.forward (elementwise)."""
    orig_shape = residual.shape
    dtype = residual.dtype
    rho2 = float(rho) ** 2  # compile-time scalar baked into the kernel

    x = residual.reshape(-1)
    n = x.shape[0]

    # Minimal tail pad (only when needed) so the data can be viewed as
    # (rows, 128). The ragged last *row block* is handled by Pallas'
    # out-of-bounds masking, so no further padding is required.
    n_pad = pl.cdiv(n, LANE) * LANE
    padded = n_pad != n
    if padded:
        x = jnp.pad(x, (0, n_pad - n))
    rows = n_pad // LANE
    x2d = x.reshape(rows, LANE)

    # Largest lane-dense block within the VMEM budget; a single block (and a
    # single grid step) when the whole problem is small.
    block_rows = rows if rows <= MAX_BLOCK_ROWS else MAX_BLOCK_ROWS
    grid = (pl.cdiv(rows, block_rows),)

    kernel = functools.partial(_gmof_kernel, rho2)
    out = pl.pallas_call(
        kernel,
        out_shape=jax.ShapeDtypeStruct((rows, LANE), dtype),
        grid_spec=pltpu.PrefetchScalarGridSpec(
            num_scalar_prefetch=0,
            grid=grid,
            in_specs=[pl.BlockSpec((block_rows, LANE), lambda i: (i, 0))],
            out_specs=pl.BlockSpec((block_rows, LANE), lambda i: (i, 0)),
        ),
        compiler_params=pltpu.CompilerParams(
            dimension_semantics=("parallel",),
            vmem_limit_bytes=32 * 1024 * 1024,
        ),
    )(x2d)

    out = out.reshape(-1)
    if padded:
        out = out[:n]
    return out.reshape(orig_shape)


def _ref_gmof(x, rho):
    sq = x ** 2
    return sq / (sq + rho ** 2)


if __name__ == "__main__":
    key = jax.random.PRNGKey(0)
    rho = 1.0

    # Residual tensor, NCHW-like small shape: batch=2, channels=4, 16x16 spatial.
    x = jax.random.normal(key, (2, 4, 16, 16), dtype=jnp.float32)
    y = jax.block_until_ready(gmof_unscaled(x, rho=rho))
    assert y.shape == x.shape and y.dtype == x.dtype
    assert jnp.allclose(y, _ref_gmof(x, rho), atol=1e-6, rtol=1e-6)

    # Ragged shape (exercises the tail-pad / boundary-mask path).
    x2 = jax.random.normal(jax.random.PRNGKey(1), (3, 5, 7), dtype=jnp.float32)
    y2 = jax.block_until_ready(gmof_unscaled(x2, rho=rho))
    assert y2.shape == x2.shape and y2.dtype == x2.dtype
    assert jnp.allclose(y2, _ref_gmof(x2, rho), atol=1e-6, rtol=1e-6)

    print("KERNEL_OK")
</pallas_src>

<mosaic_0001>
module attributes {stable_mosaic.version = 11 : i64} {
  func.func @_gmof_kernel(%arg0: i32, %arg1: memref<16x128xf32, #tpu.memory_space<vmem>>, %arg2: memref<16x128xf32, #tpu.memory_space<vmem>>) attributes {dimension_semantics = [#tpu.dimension_semantics<parallel>], iteration_bounds = array<i64: 1>, scalar_prefetch = 0 : i64, scratch_operands = 0 : i64, tpu.core_type = #tpu.core_type<tc>, window_params = [{transform_indices = @transform_0, window_bounds = array<i64: 16, 128>}, {transform_indices = @transform_1, window_bounds = array<i64: 16, 128>}]} {
    %c0 = arith.constant 0 : index
    %c0_0 = arith.constant 0 : index
    %0 = vector.load %arg1[%c0, %c0_0] : memref<16x128xf32, #tpu.memory_space<vmem>>, vector<16x128xf32>
    %1 = arith.mulf %0, %0 : vector<16x128xf32>
    %cst = arith.constant 1.000000e+00 : f32
    %2 = vector.broadcast %cst : f32 to vector<16x128xf32>
    %3 = arith.addf %1, %2 : vector<16x128xf32>
    %4 = arith.divf %1, %3 : vector<16x128xf32>
    %c0_1 = arith.constant 0 : index
    %c0_2 = arith.constant 0 : index
    %5 = vector.load %arg2[%c0_1, %c0_2] : memref<16x128xf32, #tpu.memory_space<vmem>>, vector<16x128xf32>
    tpu.vector_store %arg2[%c0_1, %c0_2], %4 {strides = array<i32>} : memref<16x128xf32, #tpu.memory_space<vmem>>, vector<16x128xf32>,
    return
  }
  func.func @transform_0(%arg0: i32) -> (i32, i32) {
    %c0_i32 = arith.constant 0 : i32
    %c0_i32_0 = arith.constant 0 : i32
    return %arg0, %c0_i32 : i32, i32
  }
  func.func @transform_1(%arg0: i32) -> (i32, i32) {
    %c0_i32 = arith.constant 0 : i32
    %c0_i32_0 = arith.constant 0 : i32
    return %arg0, %c0_i32 : i32, i32
  }
}

</mosaic_0001>

<bundles_post_ra>
// kernel: tpu_custom_call.1
= control target key start
LH: loop header
LB: loop body
LE: loop exit
PB: predicated region body
PF: predicated region fallthrough
CT: control target
= control target key end

     0   :  { %6 = vsyncpa [#allocation3], 0  ;;  %s130_s0 = inlined_call_operand.hbm [shape: f32[16,128], index: 0, kind: input, shape index: {}]   ;;  %s131_s1 = inlined_call_operand.hbm [shape: f32[16,128], index: 1, kind: output, shape index: {}]  }
   0x1   :  { %7 = vsyncpa [#allocation4], 0  ;;  %s104_s6 = smov [#allocation2]  }
   0x2   :  { %s13_s7 = sshll.u32 %s104_s6, 4  ;;  %s14_s7 = int_to_ptr.vmem [resolvable:$true] %s13_s7 }
   0x3   :  { %s68_s8 = scalar_lea.vmem %s14_s7, 256  ;;  %p73_p1 = scmp.lt.s32.totalorder %s14_s7, %s14_s7 }
   0x4   :  { %p69_p0 = scmp.ne.s32.totalorder %s14_s7, %s68_s8  ;;  %p74_p2 = scmp.lt.s32.totalorder %s68_s8, %s68_s8 }
   0x6   :  { %p75_p3 = por %p74_p2, %p73_p1 }
   0x8   :  { %p76_p4 = pnand %p75_p3, %p69_p0 }
   0xa   :  { %79 = shalt.err (!%p76_p4)
}
   0xb   :  { %s105_s9 = smov 128   ;;  %s106_s10 = smov 8  }
   0xc   :  { %19 = dma.hbm_to_vmem [thread:$0]  %s130_s0, 256, %s14_s7, [#allocation3], %s105_s9, %s105_s9, %s106_s10  }
   0xd   :  { %100 = dma.done.wait [#allocation3], 256  }
   0xe   :  { %101 = vsyncadd [#allocation3], 4294967040  ;;  %v23_v0 = vld [vmem:[#allocation2] sm:$0xff]  ;;  %v24_v1 = vld [vmem:[#allocation2 + $0x8] sm:$0xff]  ;;  %s107_s13 = smov [#allocation5]  }
   0xf   :  { %v25_v2 = vmul.f32 %v23_v0, %v23_v0  ;;  %v26_v3 = vmul.f32 %v24_v1, %v24_v1  ;;  %s40_s14 = sshll.u32 %s107_s13, 4  ;;  %s41_s14 = int_to_ptr.vmem [resolvable:$true] %s40_s14 }
  0x10   :  { %s80_s0 = scalar_lea.vmem %s41_s14, 256  ;;  %p85_p6 = scmp.lt.s32.totalorder %s41_s14, %s41_s14 }
  0x11   :  { %v27_v4 = vadd.f32 1.0, %v25_v2  ;;  %v28_v5 = vadd.f32 1.0, %v26_v3  ;;  %p81_p5 = scmp.ne.s32.totalorder %s41_s14, %s80_s0  ;;  %p86_p7 = scmp.lt.s32.totalorder %s80_s0, %s80_s0 }
  0x13   :  { %56 = vrcp.f32 %v27_v4  ;;  %p87_p8 = por %p86_p7, %p85_p6 }
  0x14   :  { %58 = vrcp.f32 %v28_v5 }
  0x15   :  { %p88_p9 = pnand %p87_p8, %p81_p5 }
  0x20   :  { %v57_v6 = vpop.eup %56 }
  0x21   :  { %v59_v7 = vpop.eup %58  ;;  %v30_v8 = vmul.f32 %v57_v6, %v25_v2 }
  0x22   :  { %v32_v9 = vmul.f32 %v59_v7, %v26_v3 }
  0x23   :  { %33 = vst [vmem:[#allocation5] sm:$0xff] %v30_v8 }
  0x24   :  { %34 = vst [vmem:[#allocation5 + $0x8] sm:$0xff] %v32_v9 }
  0x25   :  { %91 = shalt.err (!%p88_p9)
}
  0x26   :  { %46 = dma.vmem_to_hbm [thread:$0]  %s41_s14, 256, %s131_s1, [#allocation4], %s105_s9, %s105_s9, %s106_s10  }
  0x27   :  { %102 = dma.done.wait [#allocation4], 256  }
  0x28   :  { %103 = vsyncadd [#allocation4], 4294967040 }
  0x29   :  { %50 = vsyncpa [#allocation3], 1 }
  0x2a   :  { %51 = vsyncpa [#allocation4], 1 }

</bundles_post_ra>
